<compile_context>
chip_gen: v5e
topology: v5e:2x2
jax: 0.10.0
libtpu: 0.0.40
codegen_flags: <defaults>
</compile_context>

<pallas_src>
import functools

import jax
import jax.numpy as jnp
from jax.experimental import pallas as pl
from jax.experimental.pallas import tpu as pltpu


def _round_up(x, m):
    return (x + m - 1) // m * m


def _num_tensorcores():
    """Best-effort TensorCore count per chip (v7x has 2; v5e/v6e have 1)."""
    try:
        kind = jax.devices()[0].device_kind.lower()
        if "v7" in kind:
            return 2
    except Exception:
        pass
    return 1


def _pick_time_tiling(T):
    """Largest time-chunk <= 32 that divides T; otherwise pad T to a multiple of 8."""
    for c in (32, 16, 8, 4):
        if T % c == 0:
            return c, T
    return 8, _round_up(T, 8)


def _pick_batch_tile(B_p):
    """Whole padded batch per TensorCore: 1 tile on 1-TC chips, 2 tiles on v7x."""
    if _num_tensorcores() >= 2 and B_p % 16 == 0:
        return B_p // 2
    return B_p


# ---------------------------------------------------------------------------
# Fused per-layer kernel: one grid step = one (batch-tile, time-chunk) block.
#   x_ref  : (Tc, Bt, I_p) f32   layer input chunk
#   h0_ref : (Bt, H_p)     f32   initial hidden state for this batch tile
#   wih_ref: (I_p, H_p)    bf16  W_ih^T (pre-transposed, resident)
#   whh_ref: (H_p, H_p)    bf16  W_hh^T (pre-transposed, resident)
#   b_ref  : (1, H_p)      f32   b_ih + b_hh
#   out_ref: (Tc, Bt, H_p) f32   hidden states for this chunk
#   hn_ref : (Bt, H_p)     f32   resident carry; final value == h_n of the layer
# ---------------------------------------------------------------------------
def _rnn_chunk_kernel(x_ref, h0_ref, wih_ref, whh_ref, b_ref,
                      out_ref, hn_ref, *, seq_len, time_padded):
    c = pl.program_id(1)                      # time-chunk index (serial axis)

    @pl.when(c == 0)
    def _():
        hn_ref[...] = h0_ref[...]             # seed the resident carry once

    tc, bt, ip = x_ref.shape
    hp = whh_ref.shape[1]

    wih = wih_ref[...]                        # bf16, hoisted out of the loop
    whh = whh_ref[...]                        # bf16, hoisted out of the loop
    bias = b_ref[...]                         # f32 (1, hp)

    # Hoisted, fused input projection for the whole chunk: one big MXU matmul
    # (bf16 operands, f32 accumulation), staged directly into the out block so
    # no extra VMEM scratch and no pre_x HBM slab are needed.
    x2d = x_ref[...].astype(jnp.bfloat16).reshape(tc * bt, ip)
    px = jnp.dot(x2d, wih, preferred_element_type=jnp.float32) + bias
    out_ref[...] = px.reshape(tc, bt, hp)

    def step(i, h):
        pre = out_ref[i] + jnp.dot(h.astype(jnp.bfloat16), whh,
                                   preferred_element_type=jnp.float32)
        h_new = jnp.tanh(pre)
        if time_padded:
            # Freeze the carry past the true sequence end so hn_ref stays exact.
            h_new = jnp.where(c * tc + i < seq_len, h_new, h)
        out_ref[i] = h_new                    # lane-dense (8,128)-tiled store
        return h_new

    unroll = True if tc <= 8 else 8           # partial unroll for long chunks
    hn_ref[...] = jax.lax.fori_loop(0, tc, step, hn_ref[...], unroll=unroll)


def _rnn_layer_padded(x_p, h0_p, wih_p, whh_p, b_p, *, seq_len, t_chunk, b_tile):
    """One RNN layer, everything already padded to TPU tiles.

    x_p: (T_p, B_p, I_p) f32, h0_p: (B_p, H_p) f32,
    wih_p: (I_p, H_p) bf16, whh_p: (H_p, H_p) bf16, b_p: (1, H_p) f32.
    Returns (out (T_p, B_p, H_p) f32, h_n (B_p, H_p) f32).
    """
    T_p, B_p, I_p = x_p.shape
    H_p = whh_p.shape[1]
    n_b = B_p // b_tile
    n_c = T_p // t_chunk

    kernel = functools.partial(_rnn_chunk_kernel,
                               seq_len=seq_len,
                               time_padded=(T_p != seq_len))

    out_p, hn_p = pl.pallas_call(
        kernel,
        out_shape=(jax.ShapeDtypeStruct((T_p, B_p, H_p), jnp.float32),
                   jax.ShapeDtypeStruct((B_p, H_p), jnp.float32)),
        grid_spec=pltpu.PrefetchScalarGridSpec(
            num_scalar_prefetch=0,
            grid=(n_b, n_c),                  # (batch tiles, time chunks)
            in_specs=[
                pl.BlockSpec((t_chunk, b_tile, I_p), lambda bb, cc: (cc, bb, 0)),
                pl.BlockSpec((b_tile, H_p),          lambda bb, cc: (bb, 0)),
                pl.BlockSpec((I_p, H_p),             lambda bb, cc: (0, 0)),
                pl.BlockSpec((H_p, H_p),             lambda bb, cc: (0, 0)),
                pl.BlockSpec((1, H_p),               lambda bb, cc: (0, 0)),
            ],
            out_specs=[
                pl.BlockSpec((t_chunk, b_tile, H_p), lambda bb, cc: (cc, bb, 0)),
                pl.BlockSpec((b_tile, H_p),          lambda bb, cc: (bb, 0)),
            ],
        ),
        compiler_params=pltpu.CompilerParams(
            dimension_semantics=("parallel", "arbitrary")),
    )(x_p, h0_p, wih_p, whh_p, b_p)
    return out_p, hn_p


class RNNPallas:
    """JAX/Pallas equivalent of the PyTorch `RNN` module (vanilla RNN, tanh)."""

    def __init__(self, input_size, hidden_size, n_layer, key):
        self.input_size = input_size
        self.hidden_size = hidden_size
        self.num_layers = n_layer
        self.H_p = _round_up(hidden_size, 128)

        ortho = jax.nn.initializers.orthogonal()
        self.params = []       # padded, bf16 kernel weights (pre-transposed)
        self.ref_params = []   # unpadded f32 weights for the pure-JAX reference
        for layer in range(n_layer):
            in_dim = input_size if layer == 0 else hidden_size
            in_p = _round_up(in_dim, 128)
            key, k_ih, k_hh = jax.random.split(key, 3)
            # PyTorch stores W as (H, in); keep pre-transposed copies so the
            # kernel never transposes / relayouts per step.
            w_ih_t = ortho(k_ih, (hidden_size, in_dim), jnp.float32).T   # (in, H)
            w_hh_t = ortho(k_hh, (hidden_size, hidden_size), jnp.float32).T
            # biases (b_ih, b_hh) are constant-initialized to 0; keep the sum.
            b = jnp.zeros((1, hidden_size), jnp.float32)
            self.ref_params.append((w_ih_t, w_hh_t, b))

            wih_p = (jnp.zeros((in_p, self.H_p), jnp.bfloat16)
                     .at[:in_dim, :hidden_size].set(w_ih_t.astype(jnp.bfloat16)))
            whh_p = (jnp.zeros((self.H_p, self.H_p), jnp.bfloat16)
                     .at[:hidden_size, :hidden_size].set(w_hh_t.astype(jnp.bfloat16)))
            b_p = jnp.zeros((1, self.H_p), jnp.float32).at[:, :hidden_size].set(b)
            self.params.append((wih_p, whh_p, b_p))

    def __call__(self, inputs, h_0):
        """inputs: (T, B, input_size), h_0: (num_layers, B, hidden_size)."""
        T, B, I = inputs.shape
        H, H_p = self.hidden_size, self.H_p

        t_chunk, T_p = _pick_time_tiling(T)
        B_p = _round_up(B, 8)
        I_p = _round_up(I, 128)
        b_tile = _pick_batch_tile(B_p)

        # Pad once around the whole layer stack (zero pads keep padded lanes
        # exactly 0 through tanh, so the real region is unaffected).
        if (T_p, B_p, I_p) != (T, B, I):
            x = (jnp.zeros((T_p, B_p, I_p), jnp.float32)
                 .at[:T, :B, :I].set(inputs.astype(jnp.float32)))
        else:
            x = inputs.astype(jnp.float32)
        if (B_p, H_p) != (B, H):
            h0 = (jnp.zeros((self.num_layers, B_p, H_p), jnp.float32)
                  .at[:, :B, :H].set(h_0.astype(jnp.float32)))
        else:
            h0 = h_0.astype(jnp.float32)

        # TODO(synk): layers run as separate pallas_calls (activations stay
        # padded, but do round-trip HBM); a fully fused multi-layer kernel
        # would need a wavefront schedule over (layer, time).
        h_n = []
        for layer in range(self.num_layers):
            wih_p, whh_p, b_p = self.params[layer]
            x, h_last = _rnn_layer_padded(x, h0[layer], wih_p, whh_p, b_p,
                                          seq_len=T, t_chunk=t_chunk,
                                          b_tile=b_tile)
            h_n.append(h_last)

        output = x[:T, :B, :H] if (T_p, B_p, H_p) != (T, B, H) else x
        h_n = jnp.stack(h_n, axis=0)
        if (B_p, H_p) != (B, H):
            h_n = h_n[:, :B, :H]
        return output, h_n


def _reference_rnn(inputs, h_0, ref_params):
    """Pure-JAX reference (lax.scan) emulating the kernel's bf16-weight numerics."""
    def r(v):  # round operands to bf16 like the kernel's MXU inputs
        return v.astype(jnp.bfloat16).astype(jnp.float32)

    x = inputs
    h_n = []
    for layer, (w_ih_t, w_hh_t, b) in enumerate(ref_params):
        wih, whh = r(w_ih_t), r(w_hh_t)

        def step(h, x_t, wih=wih, whh=whh, b=b):
            h_new = jnp.tanh(r(x_t) @ wih + r(h) @ whh + b)
            return h_new, h_new

        h_last, ys = jax.lax.scan(step, h_0[layer], x)
        x = ys
        h_n.append(h_last)
    return x, jnp.stack(h_n, axis=0)


if __name__ == "__main__":
    T, B = 8, 2
    input_size, hidden_size, n_layer = 16, 32, 2

    key = jax.random.PRNGKey(0)
    key, k_model, k_x, k_h = jax.random.split(key, 4)

    model = RNNPallas(input_size, hidden_size, n_layer, k_model)

    inputs = jax.random.normal(k_x, (T, B, input_size), jnp.float32)
    h_0 = jax.random.normal(k_h, (n_layer, B, hidden_size), jnp.float32)

    output, h_n = model(inputs, h_0)
    output = jax.block_until_ready(output)
    h_n = jax.block_until_ready(h_n)

    assert output.shape == (T, B, hidden_size)
    assert h_n.shape == (n_layer, B, hidden_size)

    ref_out, ref_hn = _reference_rnn(inputs, h_0, model.ref_params)
    assert jnp.allclose(output, ref_out, atol=2e-3, rtol=2e-3)
    assert jnp.allclose(h_n, ref_hn, atol=2e-3, rtol=2e-3)

    print("KERNEL_OK")
</pallas_src>

<mosaic_0001>
module attributes {stable_mosaic.version = 11 : i64} {
  func.func @_rnn_chunk_kernel(%arg0: i32, %arg1: i32, %arg2: memref<8x8x128xf32, #tpu.memory_space<vmem>>, %arg3: memref<8x128xf32, #tpu.memory_space<vmem>>, %arg4: memref<128x128xbf16, #tpu.memory_space<vmem>>, %arg5: memref<128x128xbf16, #tpu.memory_space<vmem>>, %arg6: memref<1x128xf32, #tpu.memory_space<vmem>>, %arg7: memref<8x8x128xf32, #tpu.memory_space<vmem>>, %arg8: memref<8x128xf32, #tpu.memory_space<vmem>>) attributes {dimension_semantics = [#tpu.dimension_semantics<parallel>, #tpu.dimension_semantics<arbitrary>], iteration_bounds = array<i64: 1, 1>, scalar_prefetch = 0 : i64, scratch_operands = 0 : i64, tpu.core_type = #tpu.core_type<tc>, window_params = [{transform_indices = @transform_0, window_bounds = array<i64: 8, 8, 128>}, {transform_indices = @transform_1, window_bounds = array<i64: 8, 128>}, {pipeline_mode = #tpu.pipeline_mode<synchronous>, transform_indices = @transform_2, window_bounds = array<i64: 128, 128>}, {pipeline_mode = #tpu.pipeline_mode<synchronous>, transform_indices = @transform_3, window_bounds = array<i64: 128, 128>}, {pipeline_mode = #tpu.pipeline_mode<synchronous>, transform_indices = @transform_4, window_bounds = array<i64: 1, 128>}, {transform_indices = @transform_5, window_bounds = array<i64: 8, 8, 128>}, {transform_indices = @transform_6, window_bounds = array<i64: 8, 128>}]} {
    %c0_i32 = arith.constant 0 : i32
    %0 = arith.cmpi eq, %arg1, %c0_i32 : i32
    %1 = arith.extui %0 : i1 to i32
    %c0_i32_0 = arith.constant 0 : i32
    %2 = arith.cmpi ne, %1, %c0_i32_0 : i32
    scf.if %2 {
      %c0_57 = arith.constant 0 : index
      %c0_58 = arith.constant 0 : index
      %104 = vector.load %arg3[%c0_57, %c0_58] : memref<8x128xf32, #tpu.memory_space<vmem>>, vector<8x128xf32>
      %c0_59 = arith.constant 0 : index
      %c0_60 = arith.constant 0 : index
      %105 = vector.load %arg8[%c0_59, %c0_60] : memref<8x128xf32, #tpu.memory_space<vmem>>, vector<8x128xf32>
      tpu.vector_store %arg8[%c0_59, %c0_60], %104 {strides = array<i32>} : memref<8x128xf32, #tpu.memory_space<vmem>>, vector<8x128xf32>,
    } else {
    }
    %c0 = arith.constant 0 : index
    %c0_1 = arith.constant 0 : index
    %3 = vector.load %arg4[%c0, %c0_1] : memref<128x128xbf16, #tpu.memory_space<vmem>>, vector<128x128xbf16>
    %c0_2 = arith.constant 0 : index
    %c0_3 = arith.constant 0 : index
    %4 = vector.load %arg5[%c0_2, %c0_3] : memref<128x128xbf16, #tpu.memory_space<vmem>>, vector<128x128xbf16>
    %c0_4 = arith.constant 0 : index
    %c0_5 = arith.constant 0 : index
    %5 = vector.load %arg6[%c0_4, %c0_5] : memref<1x128xf32, #tpu.memory_space<vmem>>, vector<1x128xf32>
    %c0_6 = arith.constant 0 : index
    %c0_7 = arith.constant 0 : index
    %c0_8 = arith.constant 0 : index
    %6 = vector.load %arg2[%c0_6, %c0_7, %c0_8] : memref<8x8x128xf32, #tpu.memory_space<vmem>>, vector<8x8x128xf32>
    %7 = arith.truncf %6 : vector<8x8x128xf32> to vector<8x8x128xbf16>
    %8 = vector.shape_cast %7 : vector<8x8x128xbf16> to vector<64x128xbf16>
    %cst = arith.constant dense<0.000000e+00> : vector<64x128xf32>
    %9 = tpu.matmul %8, %3, %cst {dimension_numbers = #tpu.dot_dimension_numbers<[1], [0], [0], [1], [0, 0, 1, 1], [], []>} : vector<64x128xbf16>, vector<128x128xbf16>, vector<64x128xf32> -> vector<64x128xf32>
    %10 = vector.broadcast %5 : vector<1x128xf32> to vector<64x128xf32>
    %11 = arith.addf %9, %10 : vector<64x128xf32>
    %12 = vector.shape_cast %11 : vector<64x128xf32> to vector<8x8x128xf32>
    %c0_9 = arith.constant 0 : index
    %c0_10 = arith.constant 0 : index
    %c0_11 = arith.constant 0 : index
    %13 = vector.load %arg7[%c0_9, %c0_10, %c0_11] : memref<8x8x128xf32, #tpu.memory_space<vmem>>, vector<8x8x128xf32>
    tpu.vector_store %arg7[%c0_9, %c0_10, %c0_11], %12 {strides = array<i32>} : memref<8x8x128xf32, #tpu.memory_space<vmem>>, vector<8x8x128xf32>,
    %c0_12 = arith.constant 0 : index
    %c0_13 = arith.constant 0 : index
    %14 = vector.load %arg8[%c0_12, %c0_13] : memref<8x128xf32, #tpu.memory_space<vmem>>, vector<8x128xf32>
    %c0_i32_14 = arith.constant 0 : i32
    %15 = arith.index_cast %c0_i32_14 : i32 to index
    %c0_15 = arith.constant 0 : index
    %c0_16 = arith.constant 0 : index
    %16 = vector.load %arg7[%15, %c0_15, %c0_16] : memref<8x8x128xf32, #tpu.memory_space<vmem>>, vector<1x8x128xf32>
    %17 = vector.shape_cast %16 : vector<1x8x128xf32> to vector<8x128xf32>
    %18 = arith.truncf %14 : vector<8x128xf32> to vector<8x128xbf16>
    %cst_17 = arith.constant dense<0.000000e+00> : vector<8x128xf32>
    %19 = tpu.matmul %18, %4, %cst_17 {dimension_numbers = #tpu.dot_dimension_numbers<[1], [0], [0], [1], [0, 0, 1, 1], [], []>} : vector<8x128xbf16>, vector<128x128xbf16>, vector<8x128xf32> -> vector<8x128xf32>
    %20 = arith.addf %17, %19 : vector<8x128xf32>
    %21 = math.tanh %20 : vector<8x128xf32>
    %22 = arith.index_cast %c0_i32_14 : i32 to index
    %c0_18 = arith.constant 0 : index
    %c0_19 = arith.constant 0 : index
    %23 = vector.load %arg7[%22, %c0_18, %c0_19] : memref<8x8x128xf32, #tpu.memory_space<vmem>>, vector<1x8x128xf32>
    %24 = vector.shape_cast %23 : vector<1x8x128xf32> to vector<8x128xf32>
    %25 = vector.shape_cast %21 : vector<8x128xf32> to vector<1x8x128xf32>
    tpu.vector_store %arg7[%22, %c0_18, %c0_19], %25 {strides = array<i32>} : memref<8x8x128xf32, #tpu.memory_space<vmem>>, vector<1x8x128xf32>,
    %c1_i32 = arith.constant 1 : i32
    %26 = arith.index_cast %c1_i32 : i32 to index
    %c0_20 = arith.constant 0 : index
    %c0_21 = arith.constant 0 : index
    %27 = vector.load %arg7[%26, %c0_20, %c0_21] : memref<8x8x128xf32, #tpu.memory_space<vmem>>, vector<1x8x128xf32>
    %28 = vector.shape_cast %27 : vector<1x8x128xf32> to vector<8x128xf32>
    %29 = arith.truncf %21 : vector<8x128xf32> to vector<8x128xbf16>
    %cst_22 = arith.constant dense<0.000000e+00> : vector<8x128xf32>
    %30 = tpu.matmul %29, %4, %cst_22 {dimension_numbers = #tpu.dot_dimension_numbers<[1], [0], [0], [1], [0, 0, 1, 1], [], []>} : vector<8x128xbf16>, vector<128x128xbf16>, vector<8x128xf32> -> vector<8x128xf32>
    %31 = arith.addf %28, %30 : vector<8x128xf32>
    %32 = math.tanh %31 : vector<8x128xf32>
    %33 = arith.index_cast %c1_i32 : i32 to index
    %c0_23 = arith.constant 0 : index
    %c0_24 = arith.constant 0 : index
    %34 = vector.load %arg7[%33, %c0_23, %c0_24] : memref<8x8x128xf32, #tpu.memory_space<vmem>>, vector<1x8x128xf32>
    %35 = vector.shape_cast %34 : vector<1x8x128xf32> to vector<8x128xf32>
    %36 = vector.shape_cast %32 : vector<8x128xf32> to vector<1x8x128xf32>
    tpu.vector_store %arg7[%33, %c0_23, %c0_24], %36 {strides = array<i32>} : memref<8x8x128xf32, #tpu.memory_space<vmem>>, vector<1x8x128xf32>,
    %c2_i32 = arith.constant 2 : i32
    %37 = arith.index_cast %c2_i32 : i32 to index
    %c0_25 = arith.constant 0 : index
    %c0_26 = arith.constant 0 : index
    %38 = vector.load %arg7[%37, %c0_25, %c0_26] : memref<8x8x128xf32, #tpu.memory_space<vmem>>, vector<1x8x128xf32>
    %39 = vector.shape_cast %38 : vector<1x8x128xf32> to vector<8x128xf32>
    %40 = arith.truncf %32 : vector<8x128xf32> to vector<8x128xbf16>
    %cst_27 = arith.constant dense<0.000000e+00> : vector<8x128xf32>
    %41 = tpu.matmul %40, %4, %cst_27 {dimension_numbers = #tpu.dot_dimension_numbers<[1], [0], [0], [1], [0, 0, 1, 1], [], []>} : vector<8x128xbf16>, vector<128x128xbf16>, vector<8x128xf32> -> vector<8x128xf32>
    %42 = arith.addf %39, %41 : vector<8x128xf32>
    %43 = math.tanh %42 : vector<8x128xf32>
    %44 = arith.index_cast %c2_i32 : i32 to index
    %c0_28 = arith.constant 0 : index
    %c0_29 = arith.constant 0 : index
    %45 = vector.load %arg7[%44, %c0_28, %c0_29] : memref<8x8x128xf32, #tpu.memory_space<vmem>>, vector<1x8x128xf32>
    %46 = vector.shape_cast %45 : vector<1x8x128xf32> to vector<8x128xf32>
    %47 = vector.shape_cast %43 : vector<8x128xf32> to vector<1x8x128xf32>
    tpu.vector_store %arg7[%44, %c0_28, %c0_29], %47 {strides = array<i32>} : memref<8x8x128xf32, #tpu.memory_space<vmem>>, vector<1x8x128xf32>,
    %c3_i32 = arith.constant 3 : i32
    %48 = arith.index_cast %c3_i32 : i32 to index
    %c0_30 = arith.constant 0 : index
    %c0_31 = arith.constant 0 : index
    %49 = vector.load %arg7[%48, %c0_30, %c0_31] : memref<8x8x128xf32, #tpu.memory_space<vmem>>, vector<1x8x128xf32>
    %50 = vector.shape_cast %49 : vector<1x8x128xf32> to vector<8x128xf32>
    %51 = arith.truncf %43 : vector<8x128xf32> to vector<8x128xbf16>
    %cst_32 = arith.constant dense<0.000000e+00> : vector<8x128xf32>
    %52 = tpu.matmul %51, %4, %cst_32 {dimension_numbers = #tpu.dot_dimension_numbers<[1], [0], [0], [1], [0, 0, 1, 1], [], []>} : vector<8x128xbf16>, vector<128x128xbf16>, vector<8x128xf32> -> vector<8x128xf32>
    %53 = arith.addf %50, %52 : vector<8x128xf32>
    %54 = math.tanh %53 : vector<8x128xf32>
    %55 = arith.index_cast %c3_i32 : i32 to index
    %c0_33 = arith.constant 0 : index
    %c0_34 = arith.constant 0 : index
    %56 = vector.load %arg7[%55, %c0_33, %c0_34] : memref<8x8x128xf32, #tpu.memory_space<vmem>>, vector<1x8x128xf32>
    %57 = vector.shape_cast %56 : vector<1x8x128xf32> to vector<8x128xf32>
    %58 = vector.shape_cast %54 : vector<8x128xf32> to vector<1x8x128xf32>
    tpu.vector_store %arg7[%55, %c0_33, %c0_34], %58 {strides = array<i32>} : memref<8x8x128xf32, #tpu.memory_space<vmem>>, vector<1x8x128xf32>,
    %c4_i32 = arith.constant 4 : i32
    %59 = arith.index_cast %c4_i32 : i32 to index
    %c0_35 = arith.constant 0 : index
    %c0_36 = arith.constant 0 : index
    %60 = vector.load %arg7[%59, %c0_35, %c0_36] : memref<8x8x128xf32, #tpu.memory_space<vmem>>, vector<1x8x128xf32>
    %61 = vector.shape_cast %60 : vector<1x8x128xf32> to vector<8x128xf32>
    %62 = arith.truncf %54 : vector<8x128xf32> to vector<8x128xbf16>
    %cst_37 = arith.constant dense<0.000000e+00> : vector<8x128xf32>
    %63 = tpu.matmul %62, %4, %cst_37 {dimension_numbers = #tpu.dot_dimension_numbers<[1], [0], [0], [1], [0, 0, 1, 1], [], []>} : vector<8x128xbf16>, vector<128x128xbf16>, vector<8x128xf32> -> vector<8x128xf32>
    %64 = arith.addf %61, %63 : vector<8x128xf32>
    %65 = math.tanh %64 : vector<8x128xf32>
    %66 = arith.index_cast %c4_i32 : i32 to index
    %c0_38 = arith.constant 0 : index
    %c0_39 = arith.constant 0 : index
    %67 = vector.load %arg7[%66, %c0_38, %c0_39] : memref<8x8x128xf32, #tpu.memory_space<vmem>>, vector<1x8x128xf32>
    %68 = vector.shape_cast %67 : vector<1x8x128xf32> to vector<8x128xf32>
    %69 = vector.shape_cast %65 : vector<8x128xf32> to vector<1x8x128xf32>
    tpu.vector_store %arg7[%66, %c0_38, %c0_39], %69 {strides = array<i32>} : memref<8x8x128xf32, #tpu.memory_space<vmem>>, vector<1x8x128xf32>,
    %c5_i32 = arith.constant 5 : i32
    %70 = arith.index_cast %c5_i32 : i32 to index
    %c0_40 = arith.constant 0 : index
    %c0_41 = arith.constant 0 : index
    %71 = vector.load %arg7[%70, %c0_40, %c0_41] : memref<8x8x128xf32, #tpu.memory_space<vmem>>, vector<1x8x128xf32>
    %72 = vector.shape_cast %71 : vector<1x8x128xf32> to vector<8x128xf32>
    %73 = arith.truncf %65 : vector<8x128xf32> to vector<8x128xbf16>
    %cst_42 = arith.constant dense<0.000000e+00> : vector<8x128xf32>
    %74 = tpu.matmul %73, %4, %cst_42 {dimension_numbers = #tpu.dot_dimension_numbers<[1], [0], [0], [1], [0, 0, 1, 1], [], []>} : vector<8x128xbf16>, vector<128x128xbf16>, vector<8x128xf32> -> vector<8x128xf32>
    %75 = arith.addf %72, %74 : vector<8x128xf32>
    %76 = math.tanh %75 : vector<8x128xf32>
    %77 = arith.index_cast %c5_i32 : i32 to index
    %c0_43 = arith.constant 0 : index
    %c0_44 = arith.constant 0 : index
    %78 = vector.load %arg7[%77, %c0_43, %c0_44] : memref<8x8x128xf32, #tpu.memory_space<vmem>>, vector<1x8x128xf32>
    %79 = vector.shape_cast %78 : vector<1x8x128xf32> to vector<8x128xf32>
    %80 = vector.shape_cast %76 : vector<8x128xf32> to vector<1x8x128xf32>
    tpu.vector_store %arg7[%77, %c0_43, %c0_44], %80 {strides = array<i32>} : memref<8x8x128xf32, #tpu.memory_space<vmem>>, vector<1x8x128xf32>,
    %c6_i32 = arith.constant 6 : i32
    %81 = arith.index_cast %c6_i32 : i32 to index
    %c0_45 = arith.constant 0 : index
    %c0_46 = arith.constant 0 : index
    %82 = vector.load %arg7[%81, %c0_45, %c0_46] : memref<8x8x128xf32, #tpu.memory_space<vmem>>, vector<1x8x128xf32>
    %83 = vector.shape_cast %82 : vector<1x8x128xf32> to vector<8x128xf32>
    %84 = arith.truncf %76 : vector<8x128xf32> to vector<8x128xbf16>
    %cst_47 = arith.constant dense<0.000000e+00> : vector<8x128xf32>
    %85 = tpu.matmul %84, %4, %cst_47 {dimension_numbers = #tpu.dot_dimension_numbers<[1], [0], [0], [1], [0, 0, 1, 1], [], []>} : vector<8x128xbf16>, vector<128x128xbf16>, vector<8x128xf32> -> vector<8x128xf32>
    %86 = arith.addf %83, %85 : vector<8x128xf32>
    %87 = math.tanh %86 : vector<8x128xf32>
    %88 = arith.index_cast %c6_i32 : i32 to index
    %c0_48 = arith.constant 0 : index
    %c0_49 = arith.constant 0 : index
    %89 = vector.load %arg7[%88, %c0_48, %c0_49] : memref<8x8x128xf32, #tpu.memory_space<vmem>>, vector<1x8x128xf32>
    %90 = vector.shape_cast %89 : vector<1x8x128xf32> to vector<8x128xf32>
    %91 = vector.shape_cast %87 : vector<8x128xf32> to vector<1x8x128xf32>
    tpu.vector_store %arg7[%88, %c0_48, %c0_49], %91 {strides = array<i32>} : memref<8x8x128xf32, #tpu.memory_space<vmem>>, vector<1x8x128xf32>,
    %c7_i32 = arith.constant 7 : i32
    %92 = arith.index_cast %c7_i32 : i32 to index
    %c0_50 = arith.constant 0 : index
    %c0_51 = arith.constant 0 : index
    %93 = vector.load %arg7[%92, %c0_50, %c0_51] : memref<8x8x128xf32, #tpu.memory_space<vmem>>, vector<1x8x128xf32>
    %94 = vector.shape_cast %93 : vector<1x8x128xf32> to vector<8x128xf32>
    %95 = arith.truncf %87 : vector<8x128xf32> to vector<8x128xbf16>
    %cst_52 = arith.constant dense<0.000000e+00> : vector<8x128xf32>
    %96 = tpu.matmul %95, %4, %cst_52 {dimension_numbers = #tpu.dot_dimension_numbers<[1], [0], [0], [1], [0, 0, 1, 1], [], []>} : vector<8x128xbf16>, vector<128x128xbf16>, vector<8x128xf32> -> vector<8x128xf32>
    %97 = arith.addf %94, %96 : vector<8x128xf32>
    %98 = math.tanh %97 : vector<8x128xf32>
    %99 = arith.index_cast %c7_i32 : i32 to index
    %c0_53 = arith.constant 0 : index
    %c0_54 = arith.constant 0 : index
    %100 = vector.load %arg7[%99, %c0_53, %c0_54] : memref<8x8x128xf32, #tpu.memory_space<vmem>>, vector<1x8x128xf32>
    %101 = vector.shape_cast %100 : vector<1x8x128xf32> to vector<8x128xf32>
    %102 = vector.shape_cast %98 : vector<8x128xf32> to vector<1x8x128xf32>
    tpu.vector_store %arg7[%99, %c0_53, %c0_54], %102 {strides = array<i32>} : memref<8x8x128xf32, #tpu.memory_space<vmem>>, vector<1x8x128xf32>,
    %c8_i32 = arith.constant 8 : i32
    %c0_55 = arith.constant 0 : index
    %c0_56 = arith.constant 0 : index
    %103 = vector.load %arg8[%c0_55, %c0_56] : memref<8x128xf32, #tpu.memory_space<vmem>>, vector<8x128xf32>
    tpu.vector_store %arg8[%c0_55, %c0_56], %98 {strides = array<i32>} : memref<8x128xf32, #tpu.memory_space<vmem>>, vector<8x128xf32>,
    return
  }
  func.func @transform_0(%arg0: i32, %arg1: i32) -> (i32, i32, i32) {
    %c0_i32 = arith.constant 0 : i32
    %c0_i32_0 = arith.constant 0 : i32
    return %arg1, %arg0, %c0_i32 : i32, i32, i32
  }
  func.func @transform_1(%arg0: i32, %arg1: i32) -> (i32, i32) {
    %c0_i32 = arith.constant 0 : i32
    %c0_i32_0 = arith.constant 0 : i32
    return %arg0, %c0_i32 : i32, i32
  }
  func.func @transform_2(%arg0: i32, %arg1: i32) -> (i32, i32) {
    %c0_i32 = arith.constant 0 : i32
    %c0_i32_0 = arith.constant 0 : i32
    %c0_i32_1 = arith.constant 0 : i32
    return %c0_i32, %c0_i32_0 : i32, i32
  }
  func.func @transform_3(%arg0: i32, %arg1: i32) -> (i32, i32) {
    %c0_i32 = arith.constant 0 : i32
    %c0_i32_0 = arith.constant 0 : i32
    %c0_i32_1 = arith.constant 0 : i32
    return %c0_i32, %c0_i32_0 : i32, i32
  }
  func.func @transform_4(%arg0: i32, %arg1: i32) -> (i32, i32) {
    %c0_i32 = arith.constant 0 : i32
    %c0_i32_0 = arith.constant 0 : i32
    %c0_i32_1 = arith.constant 0 : i32
    return %c0_i32, %c0_i32_0 : i32, i32
  }
  func.func @transform_5(%arg0: i32, %arg1: i32) -> (i32, i32, i32) {
    %c0_i32 = arith.constant 0 : i32
    %c0_i32_0 = arith.constant 0 : i32
    return %arg1, %arg0, %c0_i32 : i32, i32, i32
  }
  func.func @transform_6(%arg0: i32, %arg1: i32) -> (i32, i32) {
    %c0_i32 = arith.constant 0 : i32
    %c0_i32_0 = arith.constant 0 : i32
    return %arg0, %c0_i32 : i32, i32
  }
}

</mosaic_0001>

<bundles_post_ra>
// kernel: tpu_custom_call.1
= control target key start
LH: loop header
LB: loop body
LE: loop exit
PB: predicated region body
PF: predicated region fallthrough
CT: control target
= control target key end

     0   :  { %12 = vsyncpa [#allocation3], 0  ;;  %s893_s0 = inlined_call_operand.hbm [shape: f32[8,8,128], index: 0, kind: input, shape index: {}]   ;;  %s894_s1 = inlined_call_operand.hbm [shape: f32[8,128], index: 1, kind: input, shape index: {}]   ;;  %s895_s2 = inlined_call_operand.hbm [shape: bf16[128,128], index: 2, kind: input, shape index: {}]   ;;  %s896_s3 = inlined_call_operand.hbm [shape: bf16[128,128], index: 3, kind: input, shape index: {}]   ;;  %s897_s4 = inlined_call_operand.vmem [shape: f32[1,128], index: 4, kind: input, shape index: {}]   ;;  %s898_s5 = inlined_call_operand.hbm [shape: f32[8,8,128], index: 5, kind: output, shape index: {0}]   ;;  %s899_s6 = inlined_call_operand.hbm [shape: f32[8,128], index: 6, kind: output, shape index: {1}]  }
   0x1   :  { %13 = vsyncpa [#allocation6], 0 }
   0x2   :  { %14 = vsyncpa [#allocation9], 0 }
   0x3   :  { %15 = vsyncpa [#allocation4], 0  ;;  %s35_s23 = sshll.u32 %s894_s1, 4  ;;  %s36_s23 = int_to_ptr.hbm [resolvable:$true] %s35_s23 }
   0x4   :  { %16 = vsyncpa [#allocation12], 0  ;;  %s751_s24 = smov [#allocation5]   ;;  %s21_s28 = sshll.u32 %s893_s0, 4  ;;  %s22_s28 = int_to_ptr.hbm [resolvable:$true] %s21_s28 }
   0x5   :  { %s37_s25 = sshll.u32 %s751_s24, 4  ;;  %s752_s29 = smov [#allocation2]   ;;  %s38_s25 = int_to_ptr.vmem [resolvable:$true] %s37_s25 }
   0x6   :  { %40 = dma.hbm_to_vmem [thread:$0]  %s36_s23, 128, %s38_s25, [#allocation6]  }
   0x7   :  { %s23_s30 = sshll.u32 %s752_s29, 4  ;;  %s753_s7 = smov 128   ;;  %s24_s30 = int_to_ptr.vmem [resolvable:$true] %s23_s30 }
   0x8   :  { %s754_s8 = smov 8   ;;  %s45_s10 = sshll.u32 %s895_s2, 4  ;;  %s46_s10 = int_to_ptr.hbm [resolvable:$true] %s45_s10 }
   0x9   :  { %29 = dma.hbm_to_vmem [thread:$0]  %s22_s28, 1024, %s24_s30, [#allocation3], %s753_s7, %s753_s7, %s754_s8  }
   0xa   :  { %s755_s11 = smov [#allocation7]   ;;  %s58_s14 = sshll.u32 %s896_s3, 4  ;;  %s59_s14 = int_to_ptr.hbm [resolvable:$true] %s58_s14 }
   0xb   :  { %s47_s12 = sshll.u32 %s755_s11, 4  ;;  %s756_s15 = smov 64   ;;  %s48_s12 = int_to_ptr.vmem [resolvable:$true] %s47_s12 }
   0xc   :  { %s757_s16 = smov 4   ;;  %s758_s17 = smov [#allocation8]  }
   0xd   :  { %53 = dma.hbm_to_vmem [thread:$0]  %s46_s10, 1024, %s48_s12, [#allocation6], %s756_s15, %s756_s15, %s757_s16  }
   0xe   :  { %s60_s18 = sshll.u32 %s758_s17, 4  ;;  %s61_s18 = int_to_ptr.vmem [resolvable:$true] %s60_s18 }
   0xf   :  { %66 = dma.hbm_to_vmem [thread:$0]  %s59_s14, 1024, %s61_s18, [#allocation9], %s756_s15, %s756_s15, %s757_s16  }
  0x10   :  { %741 = dma.done.wait [#allocation3], 1024  }
  0x11   :  { %742 = vsyncadd [#allocation3], 4294966272 }
  0x12   :  { %743 = dma.done.wait [#allocation6], 1152  }
  0x13   :  { %744 = vsyncadd [#allocation6], 4294966144 }
  0x14   :  { %745 = dma.done.wait [#allocation9], 1024  }
  0x15   :  { %746 = vsyncadd [#allocation9], 4294966272  ;;  %v561_v0 = vld [vmem:[#allocation7 + $0x38] sm:$0xff]  ;;  %v560_v2 = vld [vmem:[#allocation7 + $0x30] sm:$0xff]  ;;  %s459_s22 = sshll.u32 %s898_s5, 4  ;;  %s760_s23 = smov [#allocation11]   ;;  %s460_s22 = int_to_ptr.hbm [resolvable:$true] %s459_s22 }
  0x16   :  { %v811_v1 = vld [vmem:[#allocation8 + $0x38] sm:$0xff]  ;;  %215 = vmatpush.bf16.msra.mxu0 %v561_v0  ;;  %v814_v3 = vld [vmem:[#allocation8 + $0x30] sm:$0xff]  ;;  %v559_v4 = vld [vmem:[#allocation7 + $0x28] sm:$0xff]  ;;  %s471_s24 = sshll.u32 %s760_s23, 4  ;;  %s473_s27 = sshll.u32 %s899_s6, 4  ;;  %s472_s24 = int_to_ptr.vmem [resolvable:$true] %s471_s24  ;;  %s474_s27 = int_to_ptr.hbm [resolvable:$true] %s473_s27 }
  0x17   :  { %303 = vmatpush.bf16.msra.mxu1 %v811_v1  ;;  %322 = vmatpush.bf16.msra.mxu2 %v811_v1  ;;  %v819_v5 = vld [vmem:[#allocation8 + $0x28] sm:$0xff]  ;;  %v558_v6 = vld [vmem:[#allocation7 + $0x20] sm:$0xff]  ;;  %v557_v8 = vld [vmem:[#allocation7 + $0x18] sm:$0xff] }
  0x18   :  { %341 = vmatpush.bf16.msra.mxu3 %v811_v1  ;;  %v824_v7 = vld [vmem:[#allocation8 + $0x20] sm:$0xff]  ;;  %v829_v9 = vld [vmem:[#allocation8 + $0x18] sm:$0xff]  ;;  %v556_v10 = vld [vmem:[#allocation7 + $0x10] sm:$0xff] }
  0x19   :  { %v834_v11 = vld [vmem:[#allocation8 + $0x10] sm:$0xff]  ;;  %v124_v12 = vld [vmem:[#allocation2] sm:$0xff]  ;;  %v125_v13 = vld [vmem:[#allocation2 + $0x8] sm:$0xff] }
  0x1a   :  { %216 = vmatpush.bf16.msra.mxu0 %v560_v2  ;;  %v132_v14 = vpack.c.bf16 %v124_v12, %v124_v12  ;;  %v133_v15 = vpack.c.bf16 %v125_v13, %v125_v13  ;;  %v555_v16 = vld [vmem:[#allocation7 + $0x8] sm:$0xff]  ;;  %v554_v20 = vld [vmem:[#allocation7] sm:$0xff]  ;;  %v89_v22 = vld [vmem:[#allocation5] sm:$0xff] }
  0x1b   :  { %304 = vmatpush.bf16.msra.mxu1 %v814_v3  ;;  %323 = vmatpush.bf16.msra.mxu2 %v814_v3  ;;  %v563_v17 = vld [vmem:[#allocation8 + $0x8] sm:$0xff]  ;;  %v562_v21 = vld [vmem:[#allocation8] sm:$0xff]  ;;  %v254_v24 = vpack.c.bf16 %v89_v22, %v89_v22  ;;  %v127_v26 = vld [vmem:[#allocation2 + $0x18] sm:$0xff] }
  0x1c   :  { %342 = vmatpush.bf16.msra.mxu3 %v814_v3  ;;  %v151_v18 = vunpack.c.l.b16 %v132_v14  ;;  %v152_v19 = vunpack.c.l.b16 %v133_v15  ;;  %v126_v25 = vld [vmem:[#allocation2 + $0x10] sm:$0xff]  ;;  %v135_v28 = vpack.c.bf16 %v127_v26, %v127_v26  ;;  %v874_v32 = vld [vmem:[%s897_s4] ss:$0 sm:$0xff]  ;;  %v129_v48 = vld [vmem:[#allocation2 + $0x28] sm:$0xff]  ;;  %s759_s4 = smov [#allocation10]  }
  0x1d   :  { %v134_v27 = vpack.c.bf16 %v126_v25, %v126_v25  ;;  %v128_v47 = vld [vmem:[#allocation2 + $0x20] sm:$0xff]  ;;  %v137_v50 = vpack.c.bf16 %v129_v48, %v129_v48  ;;  %s457_s19 = sshll.u32 %s759_s4, 4  ;;  %s458_s19 = int_to_ptr.vmem [resolvable:$true] %s457_s19 }
  0x1e   :  { %217 = vmatpush.bf16.msra.mxu0 %v559_v4  ;;  %v159_v23 = vpack.c.b16 %v152_v19, %v151_v18  ;;  %v154_v30 = vunpack.c.l.b16 %v135_v28  ;;  %v136_v49 = vpack.c.bf16 %v128_v47, %v128_v47  ;;  %v130_v4 = vld [vmem:[#allocation2 + $0x30] sm:$0xff] }
  0x1f   :  { %305 = vmatpush.bf16.msra.mxu1 %v819_v5  ;;  %324 = vmatpush.bf16.msra.mxu2 %v819_v5  ;;  %v153_v29 = vunpack.c.l.b16 %v134_v27  ;;  %v156_v52 = vunpack.c.l.b16 %v137_v50 }
  0x20   :  { %343 = vmatpush.bf16.msra.mxu3 %v819_v5  ;;  %v155_v51 = vunpack.c.l.b16 %v136_v49 }
  0x21   :  { %v160_v31 = vpack.c.b16 %v154_v30, %v153_v29 }
  0x22   :  { %218 = vmatpush.bf16.msra.mxu0 %v558_v6  ;;  %v161_v53 = vpack.c.b16 %v156_v52, %v155_v51  ;;  %v138_v6 = vpack.c.bf16 %v130_v4, %v130_v4 }
  0x23   :  { %306 = vmatpush.bf16.msra.mxu1 %v824_v7  ;;  %325 = vmatpush.bf16.msra.mxu2 %v824_v7 }
  0x24   :  { %344 = vmatpush.bf16.msra.mxu3 %v824_v7 }
  0x26   :  { %219 = vmatpush.bf16.msra.mxu0 %v557_v8  ;;  %v157_v8 = vunpack.c.l.b16 %v138_v6 }
  0x27   :  { %307 = vmatpush.bf16.msra.mxu1 %v829_v9  ;;  %326 = vmatpush.bf16.msra.mxu2 %v829_v9 }
  0x28   :  { %345 = vmatpush.bf16.msra.mxu3 %v829_v9 }
  0x2a   :  { %220 = vmatpush.bf16.msra.mxu0 %v556_v10 }
  0x2b   :  { %308 = vmatpush.bf16.msra.mxu1 %v834_v11  ;;  %327 = vmatpush.bf16.msra.mxu2 %v834_v11 }
  0x2c   :  { %346 = vmatpush.bf16.msra.mxu3 %v834_v11 }
  0x2e   :  { %221 = vmatpush.bf16.msra.mxu0 %v555_v16 }
  0x2f   :  { %309 = vmatpush.bf16.msra.mxu1 %v563_v17  ;;  %328 = vmatpush.bf16.msra.mxu2 %v563_v17 }
  0x30   :  { %347 = vmatpush.bf16.msra.mxu3 %v563_v17 }
  0x32   :  { %222 = vmatpush.bf16.msra.mxu0 %v554_v20 }
  0x33   :  { %310 = vmatpush.bf16.msra.mxu1 %v562_v21  ;;  %329 = vmatpush.bf16.msra.mxu2 %v562_v21 }
  0x34   :  { %348 = vmatpush.bf16.msra.mxu3 %v562_v21 }
  0x35   :  { %223 = vmatmul.bf16.vlgmr.msra.gmra.mxu0 %v159_v23 }
  0x36   :  { %311 = vmatmul.bf16.vlgmr.msra.gmra.mxu1 %v254_v24  ;;  %417 = vmatpush.bf16.msrb.mxu0 %v811_v1 }
  0x37   :  { %360 = vmatpush.bf16.msrb.mxu1 %v811_v1  ;;  %379 = vmatpush.bf16.msrb.mxu2 %v811_v1 }
  0x38   :  { %398 = vmatpush.bf16.msrb.mxu3 %v811_v1 }
  0x3a   :  { %418 = vmatpush.bf16.msrb.mxu0 %v814_v3 }
  0x3b   :  { %361 = vmatpush.bf16.msrb.mxu1 %v814_v3  ;;  %380 = vmatpush.bf16.msrb.mxu2 %v814_v3 }
  0x3c   :  { %399 = vmatpush.bf16.msrb.mxu3 %v814_v3 }
  0x3e   :  { %419 = vmatpush.bf16.msrb.mxu0 %v819_v5 }
  0x3f   :  { %362 = vmatpush.bf16.msrb.mxu1 %v819_v5  ;;  %381 = vmatpush.bf16.msrb.mxu2 %v819_v5 }
  0x40   :  { %400 = vmatpush.bf16.msrb.mxu3 %v819_v5 }
  0x42   :  { %420 = vmatpush.bf16.msrb.mxu0 %v824_v7 }
  0x43   :  { %363 = vmatpush.bf16.msrb.mxu1 %v824_v7  ;;  %382 = vmatpush.bf16.msrb.mxu2 %v824_v7 }
  0x44   :  { %401 = vmatpush.bf16.msrb.mxu3 %v824_v7 }
  0x45   :  { %228 = vmatmul.bf16.gmra.mxu0 %v160_v31 }
  0x46   :  { %421 = vmatpush.bf16.msrb.mxu0 %v829_v9 }
  0x47   :  { %364 = vmatpush.bf16.msrb.mxu1 %v829_v9  ;;  %383 = vmatpush.bf16.msrb.mxu2 %v829_v9 }
  0x48   :  { %402 = vmatpush.bf16.msrb.mxu3 %v829_v9 }
  0x4a   :  { %422 = vmatpush.bf16.msrb.mxu0 %v834_v11 }
  0x4b   :  { %365 = vmatpush.bf16.msrb.mxu1 %v834_v11  ;;  %384 = vmatpush.bf16.msrb.mxu2 %v834_v11 }
  0x4c   :  { %403 = vmatpush.bf16.msrb.mxu3 %v834_v11 }
  0x4e   :  { %423 = vmatpush.bf16.msrb.mxu0 %v563_v17 }
  0x4f   :  { %366 = vmatpush.bf16.msrb.mxu1 %v563_v17  ;;  %385 = vmatpush.bf16.msrb.mxu2 %v563_v17 }
  0x50   :  { %404 = vmatpush.bf16.msrb.mxu3 %v563_v17 }
  0x52   :  { %424 = vmatpush.bf16.msrb.mxu0 %v562_v21 }
  0x53   :  { %367 = vmatpush.bf16.msrb.mxu1 %v562_v21  ;;  %386 = vmatpush.bf16.msrb.mxu2 %v562_v21 }
  0x54   :  { %405 = vmatpush.bf16.msrb.mxu3 %v562_v21 }
  0x55   :  { %233 = vmatmul.bf16.gmra.mxu0 %v161_v53 }
  0x57   :  { %436 = vmatpush.bf16.msra.mxu1 %v811_v1 }
  0x5b   :  { %437 = vmatpush.bf16.msra.mxu1 %v814_v3 }
  0x5f   :  { %438 = vmatpush.bf16.msra.mxu1 %v819_v5  ;;  %v131_v5 = vld [vmem:[#allocation2 + $0x38] sm:$0xff] }
  0x63   :  { %439 = vmatpush.bf16.msra.mxu1 %v824_v7  ;;  %v139_v7 = vpack.c.bf16 %v131_v5, %v131_v5 }
  0x67   :  { %440 = vmatpush.bf16.msra.mxu1 %v829_v9  ;;  %v158_v9 = vunpack.c.l.b16 %v139_v7 }
  0x69   :  { %v162_v10 = vpack.c.b16 %v158_v9, %v157_v8 }
  0x6b   :  { %441 = vmatpush.bf16.msra.mxu1 %v834_v11  ;;  %238 = vmatmul.bf16.gmra.mxu0 %v162_v10 }
  0x6f   :  { %442 = vmatpush.bf16.msra.mxu1 %v563_v17 }
  0x73   :  { %443 = vmatpush.bf16.msra.mxu1 %v562_v21 }
  0xb2   :  { %v224_v33 = vpop.f32.mrf.mxu0 }
  0xb3   :  { %v312_v34 = vpop.f32.mrf.mxu1  ;;  %v225_v35 = vadd.f32 %v874_v32, %v224_v33 }
  0xb5   :  { %v316_v36 = vadd.f32 %v312_v34, %v225_v35 }
  0xb7   :  { %581 = vtanh.f32 %v316_v36 }
  0xba   :  { %v226_v40 = vpop.f32.mrf.mxu0 }
  0xbb   :  { %v314_v37 = vpop.f32.mrf.mxu1  ;;  %v227_v41 = vadd.f32 %v874_v32, %v226_v40 }
  0xbd   :  { %v582_v38 = vpop.eup %581 }
  0xbe   :  { %318 = vst [vmem:[#allocation10] sm:$0xff] %v582_v38  ;;  %v321_v39 = vpack.c.bf16 %v582_v38, %v582_v38 }
  0xc0   :  { %330 = vmatmul.bf16.vlgmr.msra.gmra.mxu2 %v321_v39 }
  0xc2   :  { %v229_v54 = vpop.f32.mrf.mxu0 }
  0xc3   :  { %v230_v55 = vadd.f32 %v874_v32, %v229_v54 }
  0xca   :  { %v231_v61 = vpop.f32.mrf.mxu0 }
  0xcb   :  { %v232_v62 = vadd.f32 %v874_v32, %v231_v61 }
  0xd2   :  { %v234_v11 = vpop.f32.mrf.mxu0 }
  0xd3   :  { %v235_v12 = vadd.f32 %v874_v32, %v234_v11 }
  0xda   :  { %v236_v18 = vpop.f32.mrf.mxu0 }
  0xdb   :  { %v237_v19 = vadd.f32 %v874_v32, %v236_v18 }
  0xe8   :  { %v239_v25 = vpop.f32.mrf.mxu0 }
  0xe9   :  { %v240_v27 = vadd.f32 %v874_v32, %v239_v25 }
  0xf0   :  { %v241_v26 = vpop.f32.mrf.mxu0 }
  0xf1   :  { %v242_v34 = vadd.f32 %v874_v32, %v241_v26 }
 0x143   :  { %v331_v42 = vpop.f32.mrf.mxu2 }
 0x144   :  { %v335_v43 = vadd.f32 %v331_v42, %v227_v41 }
 0x146   :  { %583 = vtanh.f32 %v335_v43 }
 0x14b   :  { %v333_v44 = vpop.f32.mrf.mxu2 }
 0x14c   :  { %v584_v45 = vpop.eup %583 }
 0x14d   :  { %337 = vst [vmem:[#allocation10 + $0x8] sm:$0xff] %v584_v45  ;;  %v340_v46 = vpack.c.bf16 %v584_v45, %v584_v45 }
 0x14f   :  { %349 = vmatmul.bf16.vlgmr.msra.gmra.mxu3 %v340_v46 }
 0x1d2   :  { %v350_v56 = vpop.f32.mrf.mxu3 }
 0x1d3   :  { %v354_v57 = vadd.f32 %v350_v56, %v230_v55 }
 0x1d5   :  { %585 = vtanh.f32 %v354_v57 }
 0x1da   :  { %v352_v58 = vpop.f32.mrf.mxu3 }
 0x1db   :  { %v586_v59 = vpop.eup %585 }
 0x1dc   :  { %356 = vst [vmem:[#allocation10 + $0x10] sm:$0xff] %v586_v59  ;;  %v359_v60 = vpack.c.bf16 %v586_v59, %v586_v59 }
 0x1de   :  { %368 = vmatmul.bf16.vlgmr.msrb.gmra.mxu1 %v359_v60 }
 0x25b   :  { %v369_v63 = vpop.f32.mrf.mxu1 }
 0x25c   :  { %v373_v0 = vadd.f32 %v369_v63, %v232_v62 }
 0x25e   :  { %587 = vtanh.f32 %v373_v0 }
 0x263   :  { %v371_v1 = vpop.f32.mrf.mxu1 }
 0x264   :  { %v588_v2 = vpop.eup %587 }
 0x265   :  { %375 = vst [vmem:[#allocation10 + $0x18] sm:$0xff] %v588_v2  ;;  %v378_v3 = vpack.c.bf16 %v588_v2, %v588_v2 }
 0x267   :  { %387 = vmatmul.bf16.vlgmr.msrb.gmra.mxu2 %v378_v3 }
 0x2ea   :  { %v388_v13 = vpop.f32.mrf.mxu2 }
 0x2eb   :  { %v392_v14 = vadd.f32 %v388_v13, %v235_v12 }
 0x2ed   :  { %589 = vtanh.f32 %v392_v14 }
 0x2f2   :  { %v390_v15 = vpop.f32.mrf.mxu2 }
 0x2f3   :  { %v590_v16 = vpop.eup %589 }
 0x2f4   :  { %394 = vst [vmem:[#allocation10 + $0x20] sm:$0xff] %v590_v16  ;;  %v397_v17 = vpack.c.bf16 %v590_v16, %v590_v16 }
 0x2f6   :  { %406 = vmatmul.bf16.vlgmr.msrb.gmra.mxu3 %v397_v17 }
 0x379   :  { %v407_v20 = vpop.f32.mrf.mxu3 }
 0x37a   :  { %v411_v21 = vadd.f32 %v407_v20, %v237_v19 }
 0x37c   :  { %591 = vtanh.f32 %v411_v21 }
 0x381   :  { %v409_v22 = vpop.f32.mrf.mxu3 }
 0x382   :  { %v592_v23 = vpop.eup %591 }
 0x383   :  { %413 = vst [vmem:[#allocation10 + $0x28] sm:$0xff] %v592_v23  ;;  %v416_v24 = vpack.c.bf16 %v592_v23, %v592_v23 }
 0x385   :  { %425 = vmatmul.bf16.vlgmr.msrb.gmra.mxu0 %v416_v24 }
 0x402   :  { %v426_v28 = vpop.f32.mrf.mxu0 }
 0x403   :  { %v430_v29 = vadd.f32 %v426_v28, %v240_v27 }
 0x405   :  { %593 = vtanh.f32 %v430_v29 }
 0x40a   :  { %v428_v30 = vpop.f32.mrf.mxu0 }
 0x40b   :  { %v594_v31 = vpop.eup %593 }
 0x40c   :  { %432 = vst [vmem:[#allocation10 + $0x30] sm:$0xff] %v594_v31  ;;  %v435_v33 = vpack.c.bf16 %v594_v31, %v594_v31 }
 0x40e   :  { %444 = vmatmul.bf16.vlgmr.msra.gmra.mxu1 %v435_v33 }
 0x48b   :  { %v445_v35 = vpop.f32.mrf.mxu1 }
 0x48c   :  { %v449_v36 = vadd.f32 %v445_v35, %v242_v34 }
 0x48e   :  { %595 = vtanh.f32 %v449_v36 }
 0x493   :  { %v447_v37 = vpop.f32.mrf.mxu1 }
 0x494   :  { %v596_v38 = vpop.eup %595 }
 0x495   :  { %451 = vst [vmem:[#allocation10 + $0x38] sm:$0xff] %v596_v38 }
 0x496   :  { %452 = vst [vmem:[#allocation11] sm:$0xff] %v596_v38  ;;  %465 = dma.vmem_to_hbm [thread:$0]  %s458_s19, 1024, %s460_s22, [#allocation4], %s753_s7, %s753_s7, %s754_s8  }
 0x497   :  { %476 = dma.vmem_to_hbm [thread:$0]  %s472_s24, 128, %s474_s27, [#allocation12]  }
 0x498   :  { %747 = dma.done.wait [#allocation4], 1024  }
 0x499   :  { %748 = vsyncadd [#allocation4], 4294966272 }
 0x49a   :  { %749 = dma.done.wait [#allocation12], 128  }
 0x49b   :  { %750 = vsyncadd [#allocation12], 4294967168 }
 0x49c   :  { %485 = vsyncpa [#allocation3], 1 }
 0x49d   :  { %486 = vsyncpa [#allocation6], 1 }
 0x49e   :  { %487 = vsyncpa [#allocation9], 1 }
 0x49f   :  { %488 = vsyncpa [#allocation4], 1 }
 0x4a0   :  { %489 = vsyncpa [#allocation12], 1 }

</bundles_post_ra>
